<compile_context>
chip_gen: v7x
topology: tpu7x:2x2x1
jax: 0.10.0
libtpu: 0.0.40
codegen_flags: <defaults>
</compile_context>

<pallas_src>
import functools

import jax
import jax.numpy as jnp
from jax.experimental import pallas as pl
from jax.experimental.pallas import tpu as pltpu


def _rope_kernel(off_ref, invf_ref, cos_ref, sin_ref):
    """off_ref: (1,) int32 SMEM; invf_ref: (1, dim//2); cos/sin_ref: (tile_s, dim)."""
    tile_s, dim = cos_ref.shape
    half = dim // 2
    # positions for this tile: offset + tile_start + row index (scalar path)
    base = off_ref[0] + pl.program_id(0) * tile_s
    rows = jax.lax.broadcasted_iota(jnp.int32, (tile_s, half), 0)
    t = (rows + base).astype(jnp.float32)
    freqs = t * invf_ref[...]                      # (tile_s, dim//2), half-width
    c = jnp.cos(freqs).astype(cos_ref.dtype)       # EUP, computed once
    s = jnp.sin(freqs).astype(sin_ref.dtype)
    # emb = cat(freqs, freqs)  =>  cos = [c|c], sin = [s|s].
    # Direct lane-offset slice stores (no cross-lane concat shuffles).
    cos_ref[:, :half] = c
    cos_ref[:, half:] = c
    sin_ref[:, :half] = s
    sin_ref[:, half:] = s


def _choose_tile(seq_len: int, max_tile: int = 4096, min_tile: int = 512):
    """Returns (tile_s, seq_out). tile_s divides seq_out and seq_out >= seq_len."""
    # Small sequences: one full-extent block (always layout-legal), splitting
    # further would just pay the ~0.35us/step pipeline overhead.
    if seq_len <= 2 * min_tile:
        return seq_len, seq_len
    # Prefer >= 2 tiles (so ("parallel",) shards across both v7x TensorCores),
    # tiles that are multiples of 16 (bf16-safe) and divide seq_len exactly
    # (no padded tail -> no wrapper slice / extra HBM copy).
    cap = min(max_tile, (seq_len // 2) // 16 * 16)
    for t in range(cap, min_tile - 1, -16):
        if seq_len % t == 0:
            return t, seq_len
    # Awkward seq_len: fall back to a single full-extent block if it fits,
    # otherwise pad the tail (wrapper slices it off; rare path).
    if seq_len <= max_tile:
        return seq_len, seq_len
    t = cap
    return t, pl.cdiv(seq_len, t) * t


@functools.lru_cache(maxsize=None)
def _build_rope_call(seq_len: int, dim: int, out_dtype_name: str):
    """Builds (and caches) the pallas_call for a given (seq_len, dim, dtype)."""
    out_dtype = jnp.dtype(out_dtype_name)
    half = dim // 2
    tile_s, seq_out = _choose_tile(seq_len)
    num_tiles = seq_out // tile_s

    def out_map(i, off):
        return (0, 0, i, 0)

    out_block = pl.BlockSpec((None, None, tile_s, dim), out_map)

    call = pl.pallas_call(
        _rope_kernel,
        out_shape=(
            jax.ShapeDtypeStruct((1, 1, seq_out, dim), out_dtype),
            jax.ShapeDtypeStruct((1, 1, seq_out, dim), out_dtype),
        ),
        grid_spec=pltpu.PrefetchScalarGridSpec(
            num_scalar_prefetch=1,                     # offset -> SMEM scalar
            grid=(num_tiles,),
            in_specs=[pl.BlockSpec((1, half), lambda i, off: (0, 0))],
            out_specs=[out_block, out_block],
        ),
        compiler_params=pltpu.CompilerParams(
            dimension_semantics=("parallel",),         # seq tiles shard on v7x 2-TC
        ),
    )
    return call, seq_out


class RotaryEmbedding:
    """JAX/Pallas port of the PyTorch RotaryEmbedding module (NTK-scaled)."""

    def __init__(self, dim, max_seq_len=2048, base=10000, scaling_factor=1.0,
                 ntk_type='dynamic', out_dtype=jnp.float32):
        assert dim % 2 == 0, "rotary dim must be even"
        self.dim = dim
        self.max_seq_len = max_seq_len
        self.base = base
        self.scaling_factor = scaling_factor
        self.ntk_type = ntk_type
        self.out_dtype = jnp.dtype(out_dtype)

        # inv_freq = 1 / base ** (arange(0, dim, 2) / dim)   (length dim // 2)
        inv_freq = 1.0 / (
            base ** (jnp.arange(0, dim, 2, dtype=jnp.float32) / dim)
        )
        self.inv_freq = inv_freq                       # unscaled buffer (torch parity)
        scaled = inv_freq * scaling_factor if ntk_type == 'dynamic' else inv_freq
        self._invf_row = scaled.reshape(1, dim // 2)   # hoisted, built once

        # TODO(synk): for decode-style callers (seq_len ~ 1, moving offset),
        # precompute the (max_seq_len, dim) cos/sin tables once and slice per
        # step (or fuse table generation into the RoPE-apply/attention kernel)
        # instead of paying a kernel launch + pipeline step per decode step.

    def __call__(self, x, seq_dim=-2, offset=0):
        seq_len = x.shape[seq_dim]
        call, seq_out = _build_rope_call(seq_len, self.dim, self.out_dtype.name)

        off = jnp.asarray(offset, dtype=jnp.int32).reshape(1)
        cos, sin = call(off, self._invf_row)           # each (1, 1, seq_out, dim)
        if seq_out != seq_len:                         # rare fallback (no clean tile)
            cos = cos[:, :, :seq_len]
            sin = sin[:, :, :seq_len]
        return cos, sin


def _reference(x, dim, base, scaling_factor, ntk_type, seq_dim=-2, offset=0):
    """Pure-JAX reference mirroring the PyTorch forward."""
    seq_len = x.shape[seq_dim]
    inv_freq = 1.0 / (base ** (jnp.arange(0, dim, 2, dtype=jnp.float32) / dim))
    t = jnp.arange(offset, offset + seq_len, dtype=jnp.float32)
    scale = scaling_factor if ntk_type == 'dynamic' else 1.0
    freqs = jnp.einsum('i,j->ij', t, inv_freq * scale)
    emb = jnp.concatenate([freqs, freqs], axis=-1)
    return jnp.cos(emb)[None, None], jnp.sin(emb)[None, None]


if __name__ == "__main__":
    # --- test 1: small shape (single block path) ---------------------------
    batch, heads, seq, dim = 2, 4, 8, 32
    key = jax.random.PRNGKey(0)
    x = jax.random.normal(key, (batch, heads, seq, dim), dtype=jnp.float32)

    rope = RotaryEmbedding(dim=dim, max_seq_len=2048, base=10000,
                           scaling_factor=1.0, ntk_type='dynamic')
    cos, sin = rope(x)
    cos = jax.block_until_ready(cos)
    sin = jax.block_until_ready(sin)

    assert cos.shape == (1, 1, seq, dim), cos.shape
    assert sin.shape == (1, 1, seq, dim), sin.shape

    cos_ref, sin_ref = _reference(x, dim, 10000, 1.0, 'dynamic')
    assert jnp.allclose(cos, cos_ref, atol=1e-5, rtol=1e-5)
    assert jnp.allclose(sin, sin_ref, atol=1e-5, rtol=1e-5)

    # --- test 2: tiled path (2-tile grid), nonzero offset, non-unit scaling -
    seq2, dim2, offset2 = 2048, 64, 17
    x2 = jax.random.normal(jax.random.PRNGKey(1), (1, 2, seq2, dim2),
                           dtype=jnp.float32)
    rope2 = RotaryEmbedding(dim=dim2, max_seq_len=4096, base=10000,
                            scaling_factor=0.5, ntk_type='dynamic')
    cos2, sin2 = rope2(x2, offset=offset2)
    cos2 = jax.block_until_ready(cos2)
    sin2 = jax.block_until_ready(sin2)

    assert cos2.shape == (1, 1, seq2, dim2), cos2.shape
    cos2_ref, sin2_ref = _reference(x2, dim2, 10000, 0.5, 'dynamic',
                                    offset=offset2)
    # looser tolerance: large-phase f32 sin/cos implementation differences
    assert jnp.allclose(cos2, cos2_ref, atol=1e-3, rtol=0.0)
    assert jnp.allclose(sin2, sin2_ref, atol=1e-3, rtol=0.0)

    # --- test 3: bf16 output path (halved HBM write bytes) ------------------
    seq3, dim3 = 32, 32
    x3 = jax.random.normal(jax.random.PRNGKey(2), (1, 1, seq3, dim3),
                           dtype=jnp.float32)
    rope3 = RotaryEmbedding(dim=dim3, out_dtype=jnp.bfloat16)
    cos3, sin3 = rope3(x3)
    cos3 = jax.block_until_ready(cos3)
    sin3 = jax.block_until_ready(sin3)
    assert cos3.dtype == jnp.bfloat16 and cos3.shape == (1, 1, seq3, dim3)
    cos3_ref, sin3_ref = _reference(x3, dim3, 10000, 1.0, 'dynamic')
    assert jnp.allclose(cos3.astype(jnp.float32), cos3_ref, atol=2e-2)
    assert jnp.allclose(sin3.astype(jnp.float32), sin3_ref, atol=2e-2)

    print("KERNEL_OK")
</pallas_src>

<mosaic_0001>
module attributes {stable_mosaic.version = 11 : i64} {
  func.func @_rope_kernel(%arg0: i32, %arg1: memref<1xi32, #tpu.memory_space<smem>>, %arg2: memref<1x16xf32, #tpu.memory_space<vmem>>, %arg3: memref<1x1x8x32xf32, #tpu.memory_space<vmem>>, %arg4: memref<1x1x8x32xf32, #tpu.memory_space<vmem>>) attributes {dimension_semantics = [#tpu.dimension_semantics<parallel>], iteration_bounds = array<i64: 1>, scalar_prefetch = 1 : i64, scratch_operands = 0 : i64, tpu.core_type = #tpu.core_type<tc>, window_params = [{pipeline_mode = #tpu.pipeline_mode<synchronous>, transform_indices = @transform_0, window_bounds = array<i64: 1, 16>}, {transform_indices = @transform_1, window_bounds = array<i64: 1, 1, 8, 32>}, {transform_indices = @transform_2, window_bounds = array<i64: 1, 1, 8, 32>}]} {
    %c0 = arith.constant 0 : index
    %0 = memref.load %arg1[%c0] : memref<1xi32, #tpu.memory_space<smem>>
    %c8_i32 = arith.constant 8 : i32
    %1 = arith.muli %arg0, %c8_i32 : i32
    %2 = arith.addi %0, %1 : i32
    %3 = tpu.iota {dimensions = array<i32: 0>} : vector<8x16xi32>
    %4 = vector.broadcast %2 : i32 to vector<8x16xi32>
    %5 = arith.addi %3, %4 : vector<8x16xi32>
    %6 = arith.sitofp %5 : vector<8x16xi32> to vector<8x16xf32>
    %c0_0 = arith.constant 0 : index
    %c0_1 = arith.constant 0 : index
    %7 = vector.load %arg2[%c0_0, %c0_1] : memref<1x16xf32, #tpu.memory_space<vmem>>, vector<1x16xf32>
    %8 = vector.broadcast %7 : vector<1x16xf32> to vector<8x16xf32>
    %9 = arith.mulf %6, %8 : vector<8x16xf32>
    %10 = math.cos %9 : vector<8x16xf32>
    %11 = math.sin %9 : vector<8x16xf32>
    %c0_2 = arith.constant 0 : index
    %c0_3 = arith.constant 0 : index
    %c0_4 = arith.constant 0 : index
    %c0_5 = arith.constant 0 : index
    %12 = vector.load %arg3[%c0_2, %c0_3, %c0_4, %c0_5] : memref<1x1x8x32xf32, #tpu.memory_space<vmem>>, vector<1x1x8x16xf32>
    %13 = vector.shape_cast %12 : vector<1x1x8x16xf32> to vector<8x16xf32>
    %14 = vector.shape_cast %10 : vector<8x16xf32> to vector<1x1x8x16xf32>
    tpu.vector_store %arg3[%c0_2, %c0_3, %c0_4, %c0_5], %14 {strides = array<i32>} : memref<1x1x8x32xf32, #tpu.memory_space<vmem>>, vector<1x1x8x16xf32>,
    %c0_6 = arith.constant 0 : index
    %c0_7 = arith.constant 0 : index
    %c0_8 = arith.constant 0 : index
    %c16 = arith.constant 16 : index
    %15 = vector.load %arg3[%c0_6, %c0_7, %c0_8, %c16] : memref<1x1x8x32xf32, #tpu.memory_space<vmem>>, vector<1x1x8x16xf32>
    %16 = vector.shape_cast %15 : vector<1x1x8x16xf32> to vector<8x16xf32>
    %17 = vector.shape_cast %10 : vector<8x16xf32> to vector<1x1x8x16xf32>
    tpu.vector_store %arg3[%c0_6, %c0_7, %c0_8, %c16], %17 {strides = array<i32>} : memref<1x1x8x32xf32, #tpu.memory_space<vmem>>, vector<1x1x8x16xf32>,
    %c0_9 = arith.constant 0 : index
    %c0_10 = arith.constant 0 : index
    %c0_11 = arith.constant 0 : index
    %c0_12 = arith.constant 0 : index
    %18 = vector.load %arg4[%c0_9, %c0_10, %c0_11, %c0_12] : memref<1x1x8x32xf32, #tpu.memory_space<vmem>>, vector<1x1x8x16xf32>
    %19 = vector.shape_cast %18 : vector<1x1x8x16xf32> to vector<8x16xf32>
    %20 = vector.shape_cast %11 : vector<8x16xf32> to vector<1x1x8x16xf32>
    tpu.vector_store %arg4[%c0_9, %c0_10, %c0_11, %c0_12], %20 {strides = array<i32>} : memref<1x1x8x32xf32, #tpu.memory_space<vmem>>, vector<1x1x8x16xf32>,
    %c0_13 = arith.constant 0 : index
    %c0_14 = arith.constant 0 : index
    %c0_15 = arith.constant 0 : index
    %c16_16 = arith.constant 16 : index
    %21 = vector.load %arg4[%c0_13, %c0_14, %c0_15, %c16_16] : memref<1x1x8x32xf32, #tpu.memory_space<vmem>>, vector<1x1x8x16xf32>
    %22 = vector.shape_cast %21 : vector<1x1x8x16xf32> to vector<8x16xf32>
    %23 = vector.shape_cast %11 : vector<8x16xf32> to vector<1x1x8x16xf32>
    tpu.vector_store %arg4[%c0_13, %c0_14, %c0_15, %c16_16], %23 {strides = array<i32>} : memref<1x1x8x32xf32, #tpu.memory_space<vmem>>, vector<1x1x8x16xf32>,
    return
  }
  func.func @transform_0(%arg0: i32, %arg1: memref<1xi32, #tpu.memory_space<smem>>) -> (i32, i32) {
    %c0_i32 = arith.constant 0 : i32
    %c0_i32_0 = arith.constant 0 : i32
    %c0_i32_1 = arith.constant 0 : i32
    return %c0_i32, %c0_i32_0 : i32, i32
  }
  func.func @transform_1(%arg0: i32, %arg1: memref<1xi32, #tpu.memory_space<smem>>) -> (i32, i32, i32, i32) {
    %c0_i32 = arith.constant 0 : i32
    %c0_i32_0 = arith.constant 0 : i32
    %c0_i32_1 = arith.constant 0 : i32
    %c0_i32_2 = arith.constant 0 : i32
    return %c0_i32, %c0_i32_0, %arg0, %c0_i32_1 : i32, i32, i32, i32
  }
  func.func @transform_2(%arg0: i32, %arg1: memref<1xi32, #tpu.memory_space<smem>>) -> (i32, i32, i32, i32) {
    %c0_i32 = arith.constant 0 : i32
    %c0_i32_0 = arith.constant 0 : i32
    %c0_i32_1 = arith.constant 0 : i32
    %c0_i32_2 = arith.constant 0 : i32
    return %c0_i32, %c0_i32_0, %arg0, %c0_i32_1 : i32, i32, i32, i32
  }
}

</mosaic_0001>

<bundles_post_ra>
// kernel: tpu_custom_call.1
= control target key start
LH: loop header
LB: loop body
LE: loop exit
PB: predicated region body
PF: predicated region fallthrough
CT: control target
= control target key end

     0   :  { %10 = vsyncpa [#allocation5], 0  ;;  %v17_v0 = vlaneseq  ;;  %s435_s0 = inlined_call_operand.<no memory space> [shape: s32[1], index: 0, kind: input, shape index: {}]   ;;  %s436_s1 = inlined_call_operand.vmem [shape: f32[1,16], index: 1, kind: input, shape index: {}]   ;;  %s437_s2 = inlined_call_operand.hbm [shape: f32[1,1,8,32], index: 2, kind: output, shape index: {0}]   ;;  %s438_s3 = inlined_call_operand.hbm [shape: f32[1,1,8,32], index: 3, kind: output, shape index: {1}]  }
   0x1   :  { %v19_v1 = vstv %s435_s0 }
   0x2   :  { %v18_v2 = vshrl.u32 %v17_v0, 7 }
   0x3   :  { %11 = vsyncpa [#allocation7], 0  ;;  %v279_v4 = vld [vmem:[%s436_s1] ss:$0 sm:$0xff]  ;;  %v353_v18 = vmov 683565275  }
   0x4   :  { %v20_v3 = vadd.s32 %v19_v1, %v18_v2  ;;  %v354_v20 = vmov 2475754826   ;;  %v355_v22 = vmov 2131351028   ;;  %v356_v24 = vmov 2102212464  }
   0x5   :  { %v357_v26 = vmov 920167782   ;;  %v358_v33 = vmov 1326507024   ;;  %s359_s0 = smov 16   ;;  %s360_s1 = smov [#allocation4]  }
   0x6   :  { %v21_v5 = vcvt.s32.f32 %v20_v3  ;;  %s257_s16 = sshll.u32 %s360_s1, 4  ;;  %s361_s17 = smov [#allocation6]   ;;  %s258_s16 = int_to_ptr.vmem [resolvable:$true] %s257_s16 }
   0x7   :  { %s267_s18 = sshll.u32 %s361_s17, 4  ;;  %s305_s19 = scalar_lea.vmem %s258_s16, 128  ;;  %s268_s18 = int_to_ptr.vmem [resolvable:$true] %s267_s18 }
   0x8   :  { %v388_v6 = vmul.f32 %v279_v4, %v21_v5  ;;  %p306_p0 = scmp.ne.s32.totalorder %s258_s16, %s305_s19  ;;  %p310_p1 = scmp.lt.s32.totalorder %s258_s16, %s258_s16 }
   0x9   :  { %p311_p2 = scmp.lt.s32.totalorder %s305_s19, %s305_s19 }
   0xa   :  { %v33_v7 = vand.u32 2139095040, %v388_v6  ;;  %v30_v9 = vand.u32 2147483647, %v388_v6  ;;  %vm32_vm7 = vcmp.lt.s32.totalorder %v388_v6, 0  ;;  %vm122_vm15 = vweird.f32 %v388_v6 }
   0xb   :  { %p312_p3 = por %p311_p2, %p310_p1 }
   0xc   :  { %v34_v8 = vshrl.u32 %v33_v7, 23  ;;  %v37_v12 = vand.u32 8388607, %v30_v9  ;;  %vm31_vm8 = vcmp.le.f32.partialorder %v30_v9, 0.7853982 }
   0xd   :  { %p313_p4 = pnand %p312_p3, %p306_p0 }
   0xe   :  { %v280_v10 = vadd.s32 4294967169, %v34_v8  ;;  %v38_v15 = vor.u32 8388608, %v37_v12 }
  0x10   :  { %v40_v11 = vadd.s32 1, %v280_v10  ;;  %v78_v35 = vshll.u32 %v38_v15, 8 }
  0x12   :  { %vm41_vm0 = vcmp.gt.s32.totalorder %v40_v11, 0 }
  0x13   :  { %v42_v13 = vsel %vm41_vm0, %v40_v11, 0  ;;  %vm237_vm0 = vcmask 130048  }
  0x14   :  { %v44_v14 = vand.u32 31, %v42_v13  ;;  %v43_v16 = vshrl.u32 %v42_v13, 5 }
  0x16   :  { %v45_v17 = vsub.s32 32, %v44_v14  ;;  %v47_v19 = vshll.u32 %v353_v18, %v44_v14  ;;  %v50_v21 = vshll.u32 %v354_v20, %v44_v14  ;;  %v53_v23 = vshll.u32 %v355_v22, %v44_v14 }
  0x17   :  { %v56_v25 = vshll.u32 %v356_v24, %v44_v14  ;;  %v59_v27 = vshll.u32 %v357_v26, %v44_v14  ;;  %vm62_vm1 = vcmp.lt.s32.totalorder %v43_v16, 1  ;;  %vm65_vm2 = vcmp.lt.s32.totalorder %v43_v16, 4 }
  0x18   :  { %v46_v28 = vshrl.u32 %v353_v18, %v45_v17  ;;  %v48_v29 = vshrl.u32 %v354_v20, %v45_v17  ;;  %v51_v30 = vshrl.u32 %v355_v22, %v45_v17  ;;  %v54_v31 = vshrl.u32 %v356_v24, %v45_v17 }
  0x19   :  { %v57_v32 = vshrl.u32 %v357_v26, %v45_v17  ;;  %v60_v34 = vshrl.u32 %v358_v33, %v45_v17  ;;  %vm63_vm3 = vcmp.lt.s32.totalorder %v43_v16, 2  ;;  %vm64_vm4 = vcmp.lt.s32.totalorder %v43_v16, 3 }
  0x1a   :  { %v49_v36 = vor.u32 %v48_v29, %v47_v19  ;;  %v52_v37 = vor.u32 %v51_v30, %v50_v21  ;;  %v55_v38 = vor.u32 %v54_v31, %v53_v23 }
  0x1b   :  { %v58_v39 = vor.u32 %v57_v32, %v56_v25  ;;  %v61_v40 = vor.u32 %v60_v34, %v59_v27 }
  0x1c   :  { %v66_v41 = vsel %vm62_vm1, %v46_v28, %v49_v36  ;;  %v67_v42 = vsel %vm65_vm2, %v55_v38, 2102212464  ;;  %v70_v43 = vsel %vm62_vm1, %v49_v36, %v52_v37  ;;  %v74_v44 = vsel %vm62_vm1, %v52_v37, %v55_v38 }
  0x1d   :  { %v68_v45 = vsel %vm64_vm4, %v52_v37, %v67_v42  ;;  %v71_v46 = vsel %vm65_vm2, %v58_v39, 920167782  ;;  %v75_v47 = vsel %vm65_vm2, %v61_v40, 1326507024  ;;  %vm243_vm1 = vcmask 261248  }
  0x1e   :  { %v72_v48 = vsel %vm64_vm4, %v55_v38, %v71_v46  ;;  %v76_v49 = vsel %vm64_vm4, %v58_v39, %v75_v47  ;;  %v69_v50 = vsel %vm63_vm3, %v66_v41, %v68_v45 }
  0x1f   :  { %v73_v51 = vsel %vm63_vm3, %v70_v43, %v72_v48  ;;  %v77_v52 = vsel %vm63_vm3, %v74_v44, %v76_v49  ;;  %v85_v57 = vmul.u32 %v78_v35, %v69_v50 }
  0x20   :  { %v394_v53 = vmul.u32.u64.low %v78_v35, %v77_v52  ;;  %v395_v54 = vmul.u32.u64.high %v78_v35, %v77_v52, %v394_v53  ;;  %v397_v55 = vmul.u32.u64.low %v78_v35, %v73_v51  ;;  %v398_v56 = vmul.u32.u64.high %v78_v35, %v73_v51, %v397_v55 }
  0x22   :  { %vm87_vm5 = vc.u32 %v395_v54, %v397_v55  ;;  %v88_v58 = vadd.s32 1, %v398_v56  ;;  %v86_v5 = vadd.s32 %v397_v55, %v395_v54 }
  0x24   :  { %v89_v59 = vsel %vm87_vm5, %v88_v58, %v398_v56 }
  0x25   :  { %v90_v60 = vadd.s32 %v89_v59, %v85_v57 }
  0x27   :  { %v91_v61 = vadd.s32 536870912, %v90_v60 }
  0x29   :  { %v92_v62 = vshrl.u32 %v91_v61, 30 }
  0x2b   :  { %v93_v63 = vshll.u32 %v92_v62, 30  ;;  %v116_v20 = vsub.s32 4, %v92_v62 }
  0x2d   :  { %v94_v0 = vsub.s32 %v90_v60, %v93_v63  ;;  %v117_v23 = vsel %vm32_vm7, %v116_v20, %v92_v62 }
  0x2e   :  { %v119_v25 = vsel %vm31_vm8, 0, %v117_v23 }
  0x2f   :  { %v96_v1 = vsub.s32 0, %v94_v0  ;;  %v226_v26 = vadd.s32 3, %v119_v25  ;;  %v123_v27 = vand.u32 3, %v119_v25 }
  0x31   :  { %v281_v2 = vmin.u32 %v96_v1, %v94_v0  ;;  %v227_v28 = vand.u32 3, %v226_v26  ;;  %vm128_vm9 = vcmp.eq.s32.totalorder %v123_v27, 2  ;;  %vm125_vm11 = vcmp.eq.s32.totalorder %v123_v27, 0 }
  0x32   :  { %vm124_vm13 = vcmp.lt.s32.totalorder %v123_v27, 2 }
  0x33   :  { %v98_v3 = vclz %v281_v2  ;;  %vm232_vm10 = vcmp.eq.s32.totalorder %v227_v28, 2  ;;  %vm229_vm12 = vcmp.eq.s32.totalorder %v227_v28, 0  ;;  %vm228_vm14 = vcmp.lt.s32.totalorder %v227_v28, 2 }
  0x35   :  { %v282_v4 = vadd.s32 4294967294, %v98_v3 }
  0x37   :  { %vm283_vm6 = vcmp.lt.s32.totalorder %v282_v4, 0 }
  0x38   :  { %v101_v7 = vsel %vm283_vm6, 0, %v282_v4 }
  0x39   :  { %v102_v8 = vsub.s32 32, %v101_v7  ;;  %v103_v10 = vshll.u32 %v94_v0, %v101_v7  ;;  %v106_v11 = vsub.s32 4294967266, %v101_v7 }
  0x3b   :  { %v104_v12 = vshrl.u32 %v86_v5, %v102_v8  ;;  %v107_v13 = vadd.s32 127, %v106_v11 }
  0x3d   :  { %v105_v14 = vor.u32 %v104_v12, %v103_v10  ;;  %v108_v15 = vshll.u32 %v107_v13, 23 }
  0x3f   :  { %v109_v16 = vor.u32 4788187, %v108_v15  ;;  %v112_v17 = vcvt.s32.f32 %v105_v14 }
  0x41   :  { %v110_v18 = vand.u32 2147483647, %v109_v16 }
  0x43   :  { %v113_v19 = vmul.f32 %v112_v17, %v110_v18 }
  0x45   :  { %v114_v21 = vxor.u32 2147483648, %v113_v19 }
  0x47   :  { %v115_v22 = vsel %vm32_vm7, %v114_v21, %v113_v19 }
  0x48   :  { %v118_v24 = vsel %vm31_vm8, %v388_v6, %v115_v22 }
  0x49   :  { %301 = vcosq.f32 %v118_v24 }
  0x4a   :  { %303 = vsinq.f32 %v118_v24 }
  0x53   :  { %v302_v29 = vpop.eup %301 }
  0x54   :  { %v304_v30 = vpop.eup %303  ;;  %v129_v31 = vxor.u32 2147483648, %v302_v29 }
  0x55   :  { %v126_v9 = vxor.u32 2147483648, %v304_v30 }
  0x56   :  { %v130_v32 = vsel %vm128_vm9, %v129_v31, %v304_v30  ;;  %v234_v33 = vsel %vm232_vm10, %v129_v31, %v304_v30 }
  0x57   :  { %v127_v34 = vsel %vm125_vm11, %v302_v29, %v126_v9  ;;  %v231_v35 = vsel %vm229_vm12, %v302_v29, %v126_v9 }
  0x58   :  { %v131_v36 = vsel %vm124_vm13, %v127_v34, %v130_v32  ;;  %v235_v37 = vsel %vm228_vm14, %v231_v35, %v234_v33 }
  0x59   :  { %v132_v38 = vsel %vm122_vm15, nan, %v131_v36  ;;  %v236_v39 = vsel %vm122_vm15, nan, %v235_v37 }
  0x5a   :  { %240 = vrot.lane.b32.xlu0 %v132_v38, %s359_s0  ;;  %238 = vst.msk [vmem:[#allocation4] sm:$0xff] %vm237_vm0, %v132_v38  ;;  %245 = vst.msk [vmem:[#allocation6] sm:$0xff] %vm237_vm0, %v236_v39 }
  0x5e   :  { %247 = vrot.lane.b32.xlu0 %v236_v39, %s359_s0 }
  0xcc   :  { %v241_v40 = vpop.permute.xlu0 %240 }
  0xcd   :  { %244 = vst.msk [vmem:[#allocation4] sm:$0xff] %vm243_vm1, %v241_v40 }
  0xce   :  { %316 = shalt.err (!%p313_p4)
}
  0xcf   :  { %s317_s22 = scalar_lea.hbm %s437_s2, 128 }
  0xd0   :  { %p318_p5 = scmp.ne.s32.totalorder %s437_s2, %s317_s22  ;;  %p321_p6 = scmp.lt.u32.totalorder %s317_s22, %s437_s2 }
  0xd2   :  { %p323_p7 = pnand %p321_p6, %p318_p5 }
  0xd4   :  { %326 = shalt.err (!%p323_p7)
}
  0xd5   :  { %260 = dma.vmem_to_hbm [thread:$0]  %s258_s16, 128, %s437_s2, [#allocation5]   ;;  %v248_v6 = vpop.permute.xlu0 %247 }
  0xd6   :  { %250 = vst.msk [vmem:[#allocation6] sm:$0xff] %vm243_vm1, %v248_v6  ;;  %s327_s29 = scalar_lea.vmem %s268_s18, 128  ;;  %p332_p9 = scmp.lt.s32.totalorder %s268_s18, %s268_s18 }
  0xd7   :  { %p328_p8 = scmp.ne.s32.totalorder %s268_s18, %s327_s29  ;;  %p333_p10 = scmp.lt.s32.totalorder %s327_s29, %s327_s29 }
  0xd9   :  { %p334_p11 = por %p333_p10, %p332_p9 }
  0xdb   :  { %p335_p12 = pnand %p334_p11, %p328_p8 }
  0xdd   :  { %338 = shalt.err (!%p335_p12)
}
  0xde   :  { %s339_s5 = scalar_lea.hbm %s438_s3, 128 }
  0xdf   :  { %p340_p13 = scmp.ne.s32.totalorder %s438_s3, %s339_s5  ;;  %p343_p0 = scmp.lt.u32.totalorder %s339_s5, %s438_s3 }
  0xe1   :  { %p345_p1 = pnand %p343_p0, %p340_p13 }
  0xe3   :  { %348 = shalt.err (!%p345_p1)
}
  0xe4   :  { %270 = dma.vmem_to_hbm [thread:$0]  %s268_s18, 128, %s438_s3, [#allocation7]  }
  0xe5   :  { %349 = dma.done.wait [#allocation5], 128  }
  0xe6   :  { %350 = vsyncadd [#allocation5], 4294967168 }
  0xe7   :  { %351 = dma.done.wait [#allocation7], 128  }
  0xe8   :  { %352 = vsyncadd [#allocation7], 4294967168 }
  0xe9   :  { %277 = vsyncpa [#allocation5], 1 }
  0xea   :  { %278 = vsyncpa [#allocation7], 1 }

</bundles_post_ra>
